<compile_context>
chip_gen: v7x
topology: tpu7x:2x2x1
jax: 0.10.0
libtpu: 0.0.40
codegen_flags: <defaults>
</compile_context>

<pallas_src>
import jax
import jax.numpy as jnp
from jax.experimental import pallas as pl
from jax.experimental.pallas import tpu as pltpu


# ----------------------------- Pallas kernel --------------------------------
def _xpos_kernel(x_ref, cos_ref, sin_e_ref, sin_o_ref, o_ref):
    """Elementwise XPos application on a (TR, W) tile.

    out[j] = x[j]*cos_dup[j] + x[j+1]*sin_even[j] + x[j-1]*sin_odd[j]
    sin_even is zero on odd lanes, sin_odd is zero on even lanes, so the
    rotate wrap-around lanes never contribute.
    """
    x = x_ref[...]                       # (TR, W)
    w = x.shape[-1]
    # XLU lane rotations (positive shifts only; shift = w-1 == shift of -1).
    x_next = pltpu.roll(x, w - 1, 1)     # x_next[j] = x[(j + 1) % w]
    x_prev = pltpu.roll(x, 1, 1)         # x_prev[j] = x[(j - 1) % w]
    o_ref[...] = (
        x * cos_ref[...] + x_next * sin_e_ref[...] + x_prev * sin_o_ref[...]
    )


def _pick_row_tile(num_rows, width, itemsize):
    """Largest row tile keeping each buffer around <=512 KiB (fits the
    double-buffered pipeline well inside the smallest default scoped VMEM)."""
    target_rows = max(8, (512 * 1024) // (width * itemsize))
    if num_rows <= target_rows:
        return num_rows              # full extent (always legal)
    return (target_rows // 8) * 8    # multiple of 8 sublanes


def xpos_apply_pallas(x, cos_d, sin_e, sin_o):
    B, L, E = x.shape
    assert E % 2 == 0, "XPos requires an even embed size"

    # Lane-dense presentation: flatten (L, E) -> (R, 128) when possible so the
    # output stores are full 128-lane vst's instead of masked partial stores.
    if (L * E) % 128 == 0:
        W = 128
        R = (L * E) // 128
    else:
        W = E
        R = L

    x3 = x.reshape(B, R, W)
    cos3 = cos_d.reshape(R, W)
    sin_e3 = sin_e.reshape(R, W)
    sin_o3 = sin_o.reshape(R, W)

    TR = _pick_row_tile(R, W, x.dtype.itemsize)
    num_r = pl.cdiv(R, TR)

    out = pl.pallas_call(
        _xpos_kernel,
        out_shape=jax.ShapeDtypeStruct((B, R, W), x.dtype),
        # B is the inner (fastest-varying) axis: table block index (r, 0) is
        # constant across it, so table tiles stay resident in VMEM.
        grid=(num_r, B),
        in_specs=[
            pl.BlockSpec((None, TR, W), lambda r, b: (b, r, 0)),   # x
            pl.BlockSpec((TR, W), lambda r, b: (r, 0)),            # cos_dup
            pl.BlockSpec((TR, W), lambda r, b: (r, 0)),            # sin_even
            pl.BlockSpec((TR, W), lambda r, b: (r, 0)),            # sin_odd
        ],
        out_specs=pl.BlockSpec((None, TR, W), lambda r, b: (b, r, 0)),
        compiler_params=pltpu.CompilerParams(
            dimension_semantics=("parallel", "parallel"),
        ),
    )(x3, cos3, sin_e3, sin_o3)
    return out.reshape(B, L, E)


# ------------------------------ Glue / setup ---------------------------------
def make_xpos_scale_buffer(embed_size):
    # register_buffer('scale', (arange(0, E, 2) + 0.4*E) / (1.4*E))
    return (jnp.arange(0, embed_size, 2, dtype=jnp.float32) + 0.4 * embed_size) / (
        1.4 * embed_size
    )


def xpos_tables(scale_buf, length, scale_base, offset=0, downscale=False):
    """Build the position tables with the rotate sign/parity folded in.

    Returns (cos_dup, sin_even, sin_odd), each (L, E):
      cos_dup  = duplicate_interleave(cos * scale)
      sin_even = -sin*scale on even lanes, 0 on odd lanes
      sin_odd  =  sin*scale on odd lanes,  0 on even lanes
    """
    min_pos = -(length + offset) // 2
    max_pos = length + min_pos + offset
    pos = jnp.arange(min_pos, max_pos, dtype=jnp.float32) / scale_base
    scale = scale_buf[None, :] ** pos[:, None]              # (L+offset, E/2)

    seq_len, dim = scale.shape
    inv_freq = 1.0 / 10000.0 ** (jnp.arange(0, dim, dtype=jnp.float32) / dim)
    sinusoid = jnp.einsum(
        "i,j->ij", jnp.arange(0, seq_len, dtype=jnp.float32), inv_freq
    ).astype(scale.dtype)
    sin, cos = jnp.sin(sinusoid), jnp.cos(sinusoid)

    if seq_len > length:
        scale = scale[-length:]
        sin = sin[-length:]
        cos = cos[-length:]
    if downscale:
        scale = 1.0 / scale

    ss = sin * scale                                        # (L, E/2)
    cs = cos * scale
    zeros = jnp.zeros_like(ss)
    L_, half = ss.shape
    cos_dup = jnp.stack([cs, cs], axis=-1).reshape(L_, 2 * half)
    sin_even = jnp.stack([-ss, zeros], axis=-1).reshape(L_, 2 * half)
    sin_odd = jnp.stack([zeros, ss], axis=-1).reshape(L_, 2 * half)
    return cos_dup, sin_even, sin_odd


def xpos_forward(x, scale_buf, scale_base=512, offset=0, downscale=False):
    B, L, E = x.shape
    cos_d, sin_e, sin_o = xpos_tables(scale_buf, L, scale_base, offset, downscale)
    dt = x.dtype
    return xpos_apply_pallas(
        x, cos_d.astype(dt), sin_e.astype(dt), sin_o.astype(dt)
    )


# ------------------------ Pure-JAX reference (for checking) ------------------
def xpos_reference(x, scale_buf, scale_base=512, offset=0, downscale=False):
    """Direct port of the PyTorch forward (no table folding)."""
    B, L, E = x.shape
    min_pos = -(L + offset) // 2
    max_pos = L + min_pos + offset
    pos = jnp.arange(min_pos, max_pos, dtype=jnp.float32) / scale_base
    scale = scale_buf[None, :] ** pos[:, None]
    seq_len, dim = scale.shape
    inv_freq = 1.0 / 10000.0 ** (jnp.arange(0, dim, dtype=jnp.float32) / dim)
    sinusoid = jnp.einsum(
        "i,j->ij", jnp.arange(0, seq_len, dtype=jnp.float32), inv_freq
    )
    sin, cos = jnp.sin(sinusoid), jnp.cos(sinusoid)
    if seq_len > L:
        scale, sin, cos = scale[-L:], sin[-L:], cos[-L:]
    if downscale:
        scale = 1.0 / scale
    sin_d = jnp.repeat(sin * scale, 2, axis=1)
    cos_d = jnp.repeat(cos * scale, 2, axis=1)
    x1 = x[:, :, 0::2]
    x2 = x[:, :, 1::2]
    rot = jnp.stack([-x2, x1], axis=-1).reshape(x.shape)
    return x * cos_d + rot * sin_d


# ----------------------------------- main -------------------------------------
if __name__ == "__main__":
    key = jax.random.PRNGKey(0)
    B, L, E = 2, 8, 32          # batch, seq length, embed_size
    scale_base = 512

    x = jax.random.normal(key, (B, L, E), dtype=jnp.float32)
    scale_buf = make_xpos_scale_buffer(E)

    out = xpos_forward(x, scale_buf, scale_base=scale_base, offset=0, downscale=False)
    out = jax.block_until_ready(out)

    ref = xpos_reference(x, scale_buf, scale_base=scale_base, offset=0, downscale=False)
    assert out.shape == x.shape and out.dtype == x.dtype
    assert jnp.allclose(out, ref, atol=1e-5, rtol=1e-5)

    print("KERNEL_OK")
</pallas_src>

<mosaic_0001>
module attributes {stable_mosaic.version = 11 : i64} {
  func.func @_xpos_kernel(%arg0: i32, %arg1: i32, %arg2: memref<1x2x128xf32, #tpu.memory_space<vmem>>, %arg3: memref<2x128xf32, #tpu.memory_space<vmem>>, %arg4: memref<2x128xf32, #tpu.memory_space<vmem>>, %arg5: memref<2x128xf32, #tpu.memory_space<vmem>>, %arg6: memref<1x2x128xf32, #tpu.memory_space<vmem>>) attributes {dimension_semantics = [#tpu.dimension_semantics<parallel>, #tpu.dimension_semantics<parallel>], iteration_bounds = array<i64: 1, 2>, scalar_prefetch = 0 : i64, scratch_operands = 0 : i64, tpu.core_type = #tpu.core_type<tc>, window_params = [{transform_indices = @transform_0, window_bounds = array<i64: 1, 2, 128>}, {transform_indices = @transform_1, window_bounds = array<i64: 2, 128>}, {transform_indices = @transform_2, window_bounds = array<i64: 2, 128>}, {transform_indices = @transform_3, window_bounds = array<i64: 2, 128>}, {transform_indices = @transform_4, window_bounds = array<i64: 1, 2, 128>}]} {
    %c0 = arith.constant 0 : index
    %c0_0 = arith.constant 0 : index
    %c0_1 = arith.constant 0 : index
    %0 = vector.load %arg2[%c0, %c0_0, %c0_1] : memref<1x2x128xf32, #tpu.memory_space<vmem>>, vector<1x2x128xf32>
    %1 = vector.shape_cast %0 : vector<1x2x128xf32> to vector<2x128xf32>
    %c127_i32 = arith.constant 127 : i32
    %2 = tpu.dynamic_rotate %1 by %c127_i32 dim 1 : vector<2x128xf32>, i32 -> vector<2x128xf32>
    %c1_i32 = arith.constant 1 : i32
    %3 = tpu.dynamic_rotate %1 by %c1_i32 dim 1 : vector<2x128xf32>, i32 -> vector<2x128xf32>
    %c0_2 = arith.constant 0 : index
    %c0_3 = arith.constant 0 : index
    %4 = vector.load %arg3[%c0_2, %c0_3] : memref<2x128xf32, #tpu.memory_space<vmem>>, vector<2x128xf32>
    %5 = arith.mulf %1, %4 : vector<2x128xf32>
    %c0_4 = arith.constant 0 : index
    %c0_5 = arith.constant 0 : index
    %6 = vector.load %arg4[%c0_4, %c0_5] : memref<2x128xf32, #tpu.memory_space<vmem>>, vector<2x128xf32>
    %7 = arith.mulf %2, %6 : vector<2x128xf32>
    %8 = arith.addf %5, %7 : vector<2x128xf32>
    %c0_6 = arith.constant 0 : index
    %c0_7 = arith.constant 0 : index
    %9 = vector.load %arg5[%c0_6, %c0_7] : memref<2x128xf32, #tpu.memory_space<vmem>>, vector<2x128xf32>
    %10 = arith.mulf %3, %9 : vector<2x128xf32>
    %11 = arith.addf %8, %10 : vector<2x128xf32>
    %c0_8 = arith.constant 0 : index
    %c0_9 = arith.constant 0 : index
    %c0_10 = arith.constant 0 : index
    %12 = vector.load %arg6[%c0_8, %c0_9, %c0_10] : memref<1x2x128xf32, #tpu.memory_space<vmem>>, vector<1x2x128xf32>
    %13 = vector.shape_cast %12 : vector<1x2x128xf32> to vector<2x128xf32>
    %14 = vector.shape_cast %11 : vector<2x128xf32> to vector<1x2x128xf32>
    tpu.vector_store %arg6[%c0_8, %c0_9, %c0_10], %14 {strides = array<i32>} : memref<1x2x128xf32, #tpu.memory_space<vmem>>, vector<1x2x128xf32>,
    return
  }
  func.func @transform_0(%arg0: i32, %arg1: i32) -> (i32, i32, i32) {
    %c0_i32 = arith.constant 0 : i32
    %c0_i32_0 = arith.constant 0 : i32
    return %arg1, %arg0, %c0_i32 : i32, i32, i32
  }
  func.func @transform_1(%arg0: i32, %arg1: i32) -> (i32, i32) {
    %c0_i32 = arith.constant 0 : i32
    %c0_i32_0 = arith.constant 0 : i32
    return %arg0, %c0_i32 : i32, i32
  }
  func.func @transform_2(%arg0: i32, %arg1: i32) -> (i32, i32) {
    %c0_i32 = arith.constant 0 : i32
    %c0_i32_0 = arith.constant 0 : i32
    return %arg0, %c0_i32 : i32, i32
  }
  func.func @transform_3(%arg0: i32, %arg1: i32) -> (i32, i32) {
    %c0_i32 = arith.constant 0 : i32
    %c0_i32_0 = arith.constant 0 : i32
    return %arg0, %c0_i32 : i32, i32
  }
  func.func @transform_4(%arg0: i32, %arg1: i32) -> (i32, i32, i32) {
    %c0_i32 = arith.constant 0 : i32
    %c0_i32_0 = arith.constant 0 : i32
    return %arg1, %arg0, %c0_i32 : i32, i32, i32
  }
}

</mosaic_0001>

<bundles_post_ra>
// kernel: tpu_custom_call.1
= control target key start
LH: loop header
LB: loop body
LE: loop exit
PB: predicated region body
PF: predicated region fallthrough
CT: control target
= control target key end

     0   :  { %9 = vsyncpa [#allocation3], 0  ;;  %s839_s0 = inlined_call_operand.hbm [shape: f32[2,2,128], index: 0, kind: input, shape index: {}]   ;;  %s840_s1 = inlined_call_operand.vmem [shape: f32[2,128], index: 1, kind: input, shape index: {}]   ;;  %s841_s2 = inlined_call_operand.vmem [shape: f32[2,128], index: 2, kind: input, shape index: {}]   ;;  %s842_s3 = inlined_call_operand.vmem [shape: f32[2,128], index: 3, kind: input, shape index: {}]   ;;  %s843_s4 = inlined_call_operand.hbm [shape: f32[2,2,128], index: 4, kind: output, shape index: {}]  }
   0x1   :  { %11 = vsyncpa [#allocation3 + $0x1], 0 }
   0x2   :  { %12 = vsyncpa [#allocation4], 0 }
   0x3   :  { %14 = vsyncpa [#allocation4 + $0x1], 0  ;;  %s658_s15 = smov 0   ;;  %s660_s16 = smov 0  }
   0x4   :  { %s662_s17 = smov 0   ;;  %s664_s18 = smov 0  }
   0x5   :  { %s666_s19 = smov 0   ;;  %s668_s20 = smov 0  }
   0x6 LB: > { %s435_s21 = sadd.s32 4294967295, %s627_s20   ;;  %s436_s22 = sadd.s32 4294967294, %s627_s20   ;;  %s627_s20 = sphi %s668_s20, %s20_s20   ;;  %s623_s19 = sphi %s666_s19, %s859_s19   ;;  %s619_s18 = sphi %s664_s18, %s858_s18   ;;  %s615_s17 = sphi %s662_s17, %s857_s17   ;;  %s611_s16 = sphi %s660_s16, %s856_s16   ;;  %s607_s15 = sphi %s658_s15, %s855_s15  }
   0x7   : > { %s29_s23 = sadd.s32 1, %s623_s19  ;;  %s41_s24 = sadd.s32 1, %s615_s17 }
   0x8   : > { %p30_p0 = scmp.ge.s32.totalorder %s29_s23, 2  ;;  %p48_p1 = scmp.ne.s32.totalorder %s615_s17, %s611_s16 }
   0x9   : > { %p49_p2 = scmp.eq.s32.totalorder %s627_s20, 0  ;;  %p54_p3 = scmp.ne.s32.totalorder %s611_s16, %s607_s15 }
   0xa   : > { %s861_s23 = smov (%p30_p0, %s29_s23), 0  ;;  %p55_p5 = scmp.eq.s32.totalorder %s435_s21, 0 }
   0xb   : > { %p699_p4 = por %p49_p2, %p48_p1  ;;  %s36_s26 = ssub.s32 %s623_s19, %s861_s23 }
   0xc   : > { %p158_p6 = scmp.eq.s32.totalorder %s435_s21, 1  ;;  %p39_p7 = scmp.eq.s32.totalorder %s36_s26, 0 }
   0xd   : > { %p705_p8 = por %p55_p5, %p54_p3  ;;  %p164_p10 = scmp.eq.s32.totalorder %s436_s22, 1 }
   0xe   : > { %p709_p9 = por %p158_p6, %p48_p1  ;;  %p463_p13 = scmp.lt.s32.totalorder %s627_s20, 2 }
   0xf   : > { %s714_s29 = scalar_select %p39_p7, %s615_s17, %s41_s24  }
  0x10   : > { %s847_s28 = scalar_select %p709_p9, 1, 0 }
  0x11   : > { %p716_p11 = por %p164_p10, %p54_p3  ;;  %s205_s5 = sand.u32 1, %s615_s17  }
  0x12   : > { %s442_s6 = sshll.u32 %s205_s5, 1  ;;  %s443_s7 = sshll.u32 %s623_s19, 5 }
  0x13   : > { %s848_s30 = scalar_select %p716_p11, 1, 0 }
  0x14   : > { %s727_s10 = scalar_lea.hbm %s839_s0, %s443_s7  ;;  %s209_s11 = scalar_lea.vmem [#allocation2], %s442_s6 }
  0x15   : > { %s217_s12 = sshll.u32 %s209_s11, 4  ;;  %p733_p0 = pnand %p463_p13, %p699_p4  ;;  %s729_s12 = int_to_ptr.vmem [resolvable:$true] %s217_s12 }
  0x16   : > { %s206_s14 = scalar_lea.sflag [#allocation3], %s205_s5  ;;  %s515_s21 = scalar_lea.hbm %s727_s10, 32 }
  0x17   : > { %p516_p3 = scmp.ne.s32.totalorder %s727_s10, %s515_s21  ;;  %p517_p5 = pneg %p733_p0 }
  0x18   : > { %s520_s25 = scalar_lea.hbm %s839_s0, 64  ;;  %p521_p4 = scmp.lt.u32.totalorder %s727_s10, %s839_s0 }
  0x19   : > { %p518_p6 = pnand %p517_p5, %p516_p3  ;;  %p522_p10 = scmp.lt.u32.totalorder %s520_s25, %s515_s21 }
  0x1a   : > { %p524_p12 = scmp.lt.u32.totalorder %s515_s21, %s727_s10 }
  0x1b   : > { %p519_p7 = pneg %p518_p6  ;;  %p523_p13 = por %p522_p10, %p521_p4 }
  0x1d   : > { %p525_p1 = por %p524_p12, %p523_p13 }
  0x1f   : > { %p526_p2 = pnand %p525_p1, %p519_p7 }
  0x21   : > { %529 = shalt.err (!%p526_p2)
}
  0x22   : > { %s530_s5 = scalar_lea.vmem %s729_s12, 32  ;;  %s629_s7 = smov [#allocation2]  }
  0x23   : > { %p531_p3 = scmp.ne.s32.totalorder %s729_s12, %s530_s5  ;;  %s535_s8 = sshll.u32 %s629_s7, 4  ;;  %s536_s8 = int_to_ptr.vmem [resolvable:$false] %s535_s8 }
  0x24   : > { %s537_s9 = scalar_lea.vmem %s536_s8, 64  ;;  %p538_p9 = scmp.lt.s32.totalorder %s729_s12, %s536_s8 }
  0x25   : > { %p533_p6 = pnand %p531_p3, %p517_p5  ;;  %p539_p4 = scmp.lt.s32.totalorder %s537_s9, %s530_s5 }
  0x27   : > { %p534_p11 = pneg %p533_p6  ;;  %p540_p10 = por %p539_p4, %p538_p9 }
  0x29   : > { %p541_p12 = pnand %p540_p10, %p534_p11 }
  0x2b   : > { %544 = shalt.err (!%p541_p12)
}
  0x2c   : > { %458 = dma.hbm_to_vmem [thread:$0]  (!%p733_p0), %s727_s10, 32, %s729_s12, %s206_s14  }
  0x2d   : > { %p850_p1 = scmp.lt.s32.totalorder %s627_s20, 3  ;;  %p851_p2 = scmp.ge.s32.totalorder %s627_s20, 1 }
  0x2f   : > { %p223_p5 = pnand %p851_p2, %p850_p1 }
  0x30   : > { %s769_s11 = sand.u32 (!%p223_p5), 1, %s611_s16  }
  0x31   : > { %226 = sbr.rel (%p223_p5) target bundleno = 195 (0xc3), region = 36  ;;  %s445_s21 = sshll.u32 (!%p223_p5), %s769_s11, 1 }
  0x32   : > { %s229_s22 = scalar_lea.sflag (!%p223_p5), [#allocation3], %s769_s11  ;;  %s232_s24 = scalar_lea.vmem (!%p223_p5), [#allocation2], %s445_s21 }
  0x38   : > { %598 = dma.done.wait (%p705_p8), %s229_s22, 32  }
  0x39   : > { %600 = vsyncadd (%p705_p8), %s229_s22, 4294967264  ;;  %v281_v0 = vld [vmem:[%s232_s24] sm:$0x3]  ;;  %s630_s10 = smov 127   ;;  %s631_s12 = smov 1  }
  0x3a   : > { %282 = vrot.lane.b32.xlu0 %v281_v0, %s630_s10  ;;  %v286_v1 = vld [vmem:[%s840_s1] sm:$0x3]  ;;  %s448_s5 = sshll.u32 %s619_s18, 5  ;;  %s268_s7 = scalar_lea.vmem [#allocation5], %s445_s21 }
  0x3b   : > { %v288_v2 = vld [vmem:[%s841_s2] sm:$0x3]  ;;  %v287_v4 = vmul.f32 %v286_v1, %v281_v0  ;;  %s310_s8 = sshll.u32 %s268_s7, 4  ;;  %s790_s24 = scalar_lea.hbm %s843_s4, %s448_s5  ;;  %s792_s8 = int_to_ptr.vmem [resolvable:$true] %s310_s8 }
  0x3c   : > { %v291_v6 = vld [vmem:[%s842_s3] sm:$0x3]  ;;  %s296_s10 = scalar_lea.sflag [#allocation4], %s769_s11  ;;  %p852_p9 = scmp.ne.s32.totalorder %s847_s28, 0 }
  0x3d   : > { %s632_s18 = smov [#allocation5]  }
  0x3e   : > { %284 = vrot.lane.b32.xlu0 %v281_v0, %s631_s12  ;;  %s545_s12 = scalar_lea.vmem %s792_s8, 32  ;;  %s549_s21 = sshll.u32 %s632_s18, 4  ;;  %s550_s21 = int_to_ptr.vmem [resolvable:$false] %s549_s21 }
  0x3f   : > { %p546_p8 = scmp.ne.s32.totalorder %s792_s8, %s545_s12  ;;  %s551_s13 = scalar_lea.vmem %s550_s21, 64 }
  0x40   : > { %p552_p7 = scmp.lt.s32.totalorder %s792_s8, %s550_s21  ;;  %p553_p13 = scmp.lt.s32.totalorder %s551_s13, %s545_s12 }
  0x41   : > { %p547_p11 = pnand %p546_p8, %p852_p9 }
  0x42   : > { %p554_p3 = por %p553_p13, %p552_p7 }
  0x43   : > { %p548_p0 = pneg %p547_p11 }
  0x45   : > { %p555_p6 = pnand %p554_p3, %p548_p0 }
  0xac   : > { %v283_v3 = vpop.permute.xlu0 %282 }
  0xad   : > { %v289_v5 = vmul.f32 %v288_v2, %v283_v3 }
  0xaf   : > { %v290_v8 = vadd.f32 %v289_v5, %v287_v4 }
  0xb0   : > { %v285_v7 = vpop.permute.xlu0 %284 }
  0xb1   : > { %v292_v9 = vmul.f32 %v291_v6, %v285_v7 }
  0xb3   : > { %v293_v10 = vadd.f32 %v292_v9, %v290_v8 }
  0xb5   : > { %294 = vst [vmem:[%s268_s7] sm:$0x3] %v293_v10 }
  0xb6   : > { %558 = shalt.err (!%p555_p6)
}
  0xb7   : > { %s559_s11 = scalar_lea.hbm %s790_s24, 32  ;;  %s563_s26 = scalar_lea.hbm %s843_s4, 64 }
  0xb8   : > { %p560_p4 = scmp.ne.s32.totalorder %s790_s24, %s559_s11  ;;  %p564_p1 = scmp.lt.u32.totalorder %s790_s24, %s843_s4 }
  0xb9   : > { %p565_p2 = scmp.lt.u32.totalorder %s563_s26, %s559_s11  ;;  %p567_p8 = scmp.lt.u32.totalorder %s559_s11, %s790_s24 }
  0xba   : > { %p561_p10 = pnand %p560_p4, %p852_p9 }
  0xbb   : > { %p566_p5 = por %p565_p2, %p564_p1 }
  0xbc   : > { %p562_p12 = pneg %p561_p10 }
  0xbd   : > { %p568_p11 = por %p567_p8, %p566_p5 }
  0xbf   : > { %p569_p0 = pnand %p568_p11, %p562_p12 }
  0xc1   : > { %572 = shalt.err (!%p569_p0)
}
  0xc2   : > { %453 = dma.vmem_to_hbm [thread:$0]  (%p852_p9), %s792_s8, 32, %s790_s24, %s296_s10  }
  0xc3 PF: > { %s322_s5 = sand.u32 1, %s607_s15   ;;  %p853_p7 = scmp.ne.s32.totalorder %s848_s30, 0 }
  0xc4   : > { %p854_p13 = scmp.ge.s32.totalorder %s627_s20, 2  ;;  %s323_s7 = scalar_lea.sflag [#allocation4], %s322_s5 }
  0xc6   : > { %p460_p3 = pnand %p854_p13, %p853_p7 }
  0xc8   : > { %602 = dma.done.wait (!%p460_p3), %s323_s7, 32  }
  0xc9   : > { %604 = vsyncadd (!%p460_p3), %s323_s7, 4294967264  ;;  %s20_s20 = sadd.s32 1, %s627_s20   ;;  %s855_s15 = smov %s611_s16 }
  0xca   : > { %p17_p6 = scmp.ge.s32.totalorder %s20_s20, 4   ;;  %s856_s16 = smov %s615_s17 }
  0xcb   : > { %s857_s17 = smov %s714_s29  ;;  %s858_s18 = smov %s623_s19 }
  0xcc   : > { %s859_s19 = smov %s861_s23  ;;  %19 = sbr.rel (!%p17_p6) target bundleno = 6 (0x6), region = 90 }
  0xd3   :  { %328 = vsyncpa [#allocation3], 1 }
  0xd4   :  { %330 = vsyncpa [#allocation3 + $0x1], 1 }
  0xd5   :  { %331 = vsyncpa [#allocation4], 1 }
  0xd6   :  { %333 = vsyncpa [#allocation4 + $0x1], 1 }

</bundles_post_ra>
